<compile_context>
chip_gen: v5e
topology: v5e:2x2
jax: 0.10.0
libtpu: 0.0.40
codegen_flags: <defaults>
</compile_context>

<pallas_src>
import jax
import jax.numpy as jnp
from jax.experimental import pallas as pl
from jax.experimental.pallas import tpu as pltpu


# ----------------------------------------------------------------------------
# Kernels
# ----------------------------------------------------------------------------
def _center_loss_resident_kernel(labels_ref, x_ref, centers_ref, out_ref, cg_ref):
    """Centers table resident in VMEM; gather rows with dynamic indexing."""
    pid = pl.program_id(0)
    tb = x_ref.shape[0]  # static tile size

    def gather_one(i):
        lbl = labels_ref[pid * tb + i]          # SMEM scalar read
        cg_ref[i, :] = centers_ref[lbl, :]      # dynamic row load / store in VMEM

    if tb <= 128:
        # Fully unrolled at trace time -> full LLO scheduler visibility.
        for i in range(tb):
            gather_one(i)
    else:
        @pl.loop(0, tb)
        def _(i):
            gather_one(i)

    xb = x_ref[...]
    cb = cg_ref[...]
    cdtype = jnp.promote_types(xb.dtype, cb.dtype)
    diff = xb.astype(cdtype) - cb.astype(cdtype)
    # Square in the (possibly bf16) input dtype, accumulate the row sum in f32.
    per_row = jnp.sum(diff * diff, axis=1, keepdims=True, dtype=jnp.float32)
    # PyTorch clamps after masking; the surviving diagonal entry gets this clamp.
    out_ref[...] = jnp.clip(per_row, 1e-12, 1e12)


def _center_loss_gather_kernel(labels_ref, x_ref, centers_hbm, out_ref, cg_ref, sems):
    """Fallback: centers stay in HBM; double-buffered row gather across steps."""
    pid = pl.program_id(0)
    nsteps = pl.num_programs(0)
    tb = x_ref.shape[0]

    def issue(tile, slot):
        # All tb row DMAs of one tile signal the same semaphore slot.
        @pl.loop(0, tb)
        def _(i):
            lbl = labels_ref[tile * tb + i]
            pltpu.make_async_copy(
                centers_hbm.at[pl.ds(lbl, 1), :],
                cg_ref.at[slot, pl.ds(i, 1), :],
                sems.at[slot],
            ).start()

    # Prime the pipeline with the first tile.
    @pl.when(pid == 0)
    def _():
        issue(0, 0)

    slot = jax.lax.rem(pid, 2)

    # Prefetch the next tile's rows into the other slot (hidden behind compute).
    @pl.when(pid + 1 < nsteps)
    def _():
        issue(pid + 1, 1 - slot)

    # Single aggregate wait: tb copies of (1, D) == one (tb, D) worth of bytes.
    pltpu.make_async_copy(cg_ref.at[slot], cg_ref.at[slot], sems.at[slot]).wait()

    xb = x_ref[...]
    cb = cg_ref[slot]
    cdtype = jnp.promote_types(xb.dtype, cb.dtype)
    diff = xb.astype(cdtype) - cb.astype(cdtype)
    per_row = jnp.sum(diff * diff, axis=1, keepdims=True, dtype=jnp.float32)
    out_ref[...] = jnp.clip(per_row, 1e-12, 1e12)


# ----------------------------------------------------------------------------
# Wrapper
# ----------------------------------------------------------------------------
def _divisors(n):
    ds = set()
    i = 1
    while i * i <= n:
        if n % i == 0:
            ds.add(i)
            ds.add(n // i)
        i += 1
    return sorted(ds)


def center_loss(x, centers, labels, *, tb=None, force_gather=False):
    """x: (B, D) float, centers: (C, D) float, labels: (B,) int -> scalar f32 loss."""
    B, D = x.shape
    C, Dc = centers.shape
    if D != Dc:
        raise ValueError(f"feat_dim mismatch: {D} vs {Dc}")

    # OOB labels would index VMEM/HBM unchecked -> clamp defensively.
    labels_i32 = jnp.clip(labels.astype(jnp.int32), 0, C - 1)

    x_bytes = jnp.dtype(x.dtype).itemsize
    c_bytes = jnp.dtype(centers.dtype).itemsize

    VMEM_LIMIT = 32 * 1024 * 1024   # explicit scoped limit: ok on v5e/v6e/v7x
    VMEM_TARGET = 26 * 1024 * 1024  # our own accounting stays under the limit

    centers_bytes = C * D * c_bytes
    # Resident only if a (conservatively double-buffered) centers block still
    # leaves >= ~12 MiB for x tiles + gather scratch -- safe on v7x's 64 MiB.
    resident = (not force_gather) and (2 * centers_bytes <= 14 * 1024 * 1024)

    if resident:
        per_row_bytes = D * (2 * x_bytes + c_bytes)      # x dbl-buffer + gather scratch
        avail = VMEM_TARGET - 2 * centers_bytes
    else:
        per_row_bytes = D * (2 * x_bytes + 2 * c_bytes)  # x dbl-buffer + (2,tb,D) scratch
        avail = VMEM_TARGET
    tb_cap = max(8, avail // per_row_bytes)

    if tb is None:
        cands = [d for d in _divisors(B) if d % 8 == 0 and d <= tb_cap]
        if B >= 16:
            # Prefer >= 2 grid steps so "parallel" can shard across v7x's 2 TCs.
            half = [d for d in cands if d <= B // 2]
            if half:
                cands = half
        tb = max(cands) if cands else B
    if B % tb != 0:
        raise ValueError(f"batch {B} not divisible by tile {tb}")
    grid = (B // tb,)

    if resident:
        kernel = _center_loss_resident_kernel
        in_specs = [
            pl.BlockSpec((tb, D), lambda i, labels: (i, 0)),   # x: pipelined tiles
            pl.BlockSpec((C, D), lambda i, labels: (0, 0)),    # centers: VMEM-resident
        ]
        scratch_shapes = [pltpu.VMEM((tb, D), centers.dtype)]  # gathered rows
        dim_sem = ("parallel",)                                # steps independent
        bytes_accessed = B * D * x_bytes + C * D * c_bytes + 4 * B + 4 * B
    else:
        kernel = _center_loss_gather_kernel
        in_specs = [
            pl.BlockSpec((tb, D), lambda i, labels: (i, 0)),   # x: pipelined tiles
            pl.BlockSpec(memory_space=pl.ANY),                 # centers stay in HBM
        ]
        scratch_shapes = [
            pltpu.VMEM((2, tb, D), centers.dtype),             # double-buffered gather
            pltpu.SemaphoreType.DMA((2,)),                     # one shared sem per slot
        ]
        dim_sem = ("arbitrary",)                               # cross-step prefetch carry
        bytes_accessed = B * D * x_bytes + B * D * c_bytes + 4 * B + 4 * B

    cost = pl.CostEstimate(
        flops=3 * B * D,          # sub, mul, add per element
        transcendentals=0,
        bytes_accessed=int(bytes_accessed),
    )

    per_sample = pl.pallas_call(
        kernel,
        out_shape=jax.ShapeDtypeStruct((B, 1), jnp.float32),
        grid_spec=pltpu.PrefetchScalarGridSpec(
            num_scalar_prefetch=1,            # labels -> SMEM
            grid=grid,
            in_specs=in_specs,
            out_specs=pl.BlockSpec((tb, 1), lambda i, labels: (i, 0)),
            scratch_shapes=scratch_shapes,
        ),
        compiler_params=pltpu.CompilerParams(
            dimension_semantics=dim_sem,
            vmem_limit_bytes=VMEM_LIMIT,
        ),
        cost_estimate=cost,
    )(labels_i32, x, centers)

    # PyTorch clamps AFTER masking, so each of the (C-1) masked zeros per sample
    # contributes 1e-12 to the sum; add that bias back explicitly.
    bias = jnp.float32(B * (C - 1) * 1e-12)
    return (jnp.sum(per_sample) + bias) / jnp.float32(B)


# ----------------------------------------------------------------------------
# Self-test
# ----------------------------------------------------------------------------
if __name__ == "__main__":
    # Small shapes consistent with the module: batch=16, feat_dim=128, classes=8.
    batch, feat_dim, num_classes = 16, 128, 8

    key = jax.random.PRNGKey(0)
    k_x, k_c, k_l = jax.random.split(key, 3)

    x = jax.random.normal(k_x, (batch, feat_dim), dtype=jnp.float32)
    centers = jax.random.normal(k_c, (num_classes, feat_dim), dtype=jnp.float32)
    labels = jax.random.randint(k_l, (batch,), 0, num_classes, dtype=jnp.int32)

    loss = jax.jit(center_loss)(x, centers, labels)
    jax.block_until_ready(loss)

    # Pure-JAX reference with the exact PyTorch math (expand + addmm + mask +
    # clamp-after-mask).
    x_sq = jnp.sum(x * x, axis=1, keepdims=True)
    c_sq = jnp.sum(centers * centers, axis=1, keepdims=True).T
    distmat = x_sq + c_sq - 2.0 * (x @ centers.T)
    mask = (labels[:, None] == jnp.arange(num_classes)[None, :]).astype(jnp.float32)
    ref = jnp.sum(jnp.clip(distmat * mask, 1e-12, 1e12)) / batch

    assert jnp.allclose(loss, ref, rtol=1e-4, atol=1e-3), (loss, ref)
    print("KERNEL_OK")
</pallas_src>

<mosaic_0001>
module attributes {stable_mosaic.version = 11 : i64} {
  func.func @_center_loss_resident_kernel(%arg0: i32, %arg1: memref<16xi32, #tpu.memory_space<smem>>, %arg2: memref<8x128xf32, #tpu.memory_space<vmem>>, %arg3: memref<8x128xf32, #tpu.memory_space<vmem>>, %arg4: memref<8x1xf32, #tpu.memory_space<vmem>>, %arg5: memref<8x128xf32, #tpu.memory_space<vmem>>) attributes {dimension_semantics = [#tpu.dimension_semantics<parallel>], iteration_bounds = array<i64: 2>, scalar_prefetch = 1 : i64, scratch_operands = 1 : i64, tpu.core_type = #tpu.core_type<tc>, window_params = [{transform_indices = @transform_0, window_bounds = array<i64: 8, 128>}, {pipeline_mode = #tpu.pipeline_mode<synchronous>, transform_indices = @transform_1, window_bounds = array<i64: 8, 128>}, {transform_indices = @transform_2, window_bounds = array<i64: 8, 1>}]} {
    %c8_i32 = arith.constant 8 : i32
    %0 = arith.muli %arg0, %c8_i32 : i32
    %c0_i32 = arith.constant 0 : i32
    %1 = arith.addi %0, %c0_i32 : i32
    %2 = arith.index_cast %1 : i32 to index
    %3 = memref.load %arg1[%2] : memref<16xi32, #tpu.memory_space<smem>>
    %4 = arith.index_cast %3 : i32 to index
    %c0 = arith.constant 0 : index
    %5 = vector.load %arg3[%4, %c0] : memref<8x128xf32, #tpu.memory_space<vmem>>, vector<1x128xf32>
    %6 = vector.shape_cast %5 : vector<1x128xf32> to vector<128xf32>
    %c0_0 = arith.constant 0 : index
    %c0_1 = arith.constant 0 : index
    %7 = vector.load %arg5[%c0_0, %c0_1] : memref<8x128xf32, #tpu.memory_space<vmem>>, vector<1x128xf32>
    %8 = vector.shape_cast %7 : vector<1x128xf32> to vector<128xf32>
    %9 = vector.shape_cast %6 : vector<128xf32> to vector<1x128xf32>
    tpu.vector_store %arg5[%c0_0, %c0_1], %9 {strides = array<i32>} : memref<8x128xf32, #tpu.memory_space<vmem>>, vector<1x128xf32>,
    %c8_i32_2 = arith.constant 8 : i32
    %10 = arith.muli %arg0, %c8_i32_2 : i32
    %c1_i32 = arith.constant 1 : i32
    %11 = arith.addi %10, %c1_i32 : i32
    %12 = arith.index_cast %11 : i32 to index
    %13 = memref.load %arg1[%12] : memref<16xi32, #tpu.memory_space<smem>>
    %14 = arith.index_cast %13 : i32 to index
    %c0_3 = arith.constant 0 : index
    %15 = vector.load %arg3[%14, %c0_3] : memref<8x128xf32, #tpu.memory_space<vmem>>, vector<1x128xf32>
    %16 = vector.shape_cast %15 : vector<1x128xf32> to vector<128xf32>
    %c1 = arith.constant 1 : index
    %c0_4 = arith.constant 0 : index
    %17 = vector.load %arg5[%c1, %c0_4] : memref<8x128xf32, #tpu.memory_space<vmem>>, vector<1x128xf32>
    %18 = vector.shape_cast %17 : vector<1x128xf32> to vector<128xf32>
    %19 = vector.shape_cast %16 : vector<128xf32> to vector<1x128xf32>
    tpu.vector_store %arg5[%c1, %c0_4], %19 {strides = array<i32>} : memref<8x128xf32, #tpu.memory_space<vmem>>, vector<1x128xf32>,
    %c8_i32_5 = arith.constant 8 : i32
    %20 = arith.muli %arg0, %c8_i32_5 : i32
    %c2_i32 = arith.constant 2 : i32
    %21 = arith.addi %20, %c2_i32 : i32
    %22 = arith.index_cast %21 : i32 to index
    %23 = memref.load %arg1[%22] : memref<16xi32, #tpu.memory_space<smem>>
    %24 = arith.index_cast %23 : i32 to index
    %c0_6 = arith.constant 0 : index
    %25 = vector.load %arg3[%24, %c0_6] : memref<8x128xf32, #tpu.memory_space<vmem>>, vector<1x128xf32>
    %26 = vector.shape_cast %25 : vector<1x128xf32> to vector<128xf32>
    %c2 = arith.constant 2 : index
    %c0_7 = arith.constant 0 : index
    %27 = vector.load %arg5[%c2, %c0_7] : memref<8x128xf32, #tpu.memory_space<vmem>>, vector<1x128xf32>
    %28 = vector.shape_cast %27 : vector<1x128xf32> to vector<128xf32>
    %29 = vector.shape_cast %26 : vector<128xf32> to vector<1x128xf32>
    tpu.vector_store %arg5[%c2, %c0_7], %29 {strides = array<i32>} : memref<8x128xf32, #tpu.memory_space<vmem>>, vector<1x128xf32>,
    %c8_i32_8 = arith.constant 8 : i32
    %30 = arith.muli %arg0, %c8_i32_8 : i32
    %c3_i32 = arith.constant 3 : i32
    %31 = arith.addi %30, %c3_i32 : i32
    %32 = arith.index_cast %31 : i32 to index
    %33 = memref.load %arg1[%32] : memref<16xi32, #tpu.memory_space<smem>>
    %34 = arith.index_cast %33 : i32 to index
    %c0_9 = arith.constant 0 : index
    %35 = vector.load %arg3[%34, %c0_9] : memref<8x128xf32, #tpu.memory_space<vmem>>, vector<1x128xf32>
    %36 = vector.shape_cast %35 : vector<1x128xf32> to vector<128xf32>
    %c3 = arith.constant 3 : index
    %c0_10 = arith.constant 0 : index
    %37 = vector.load %arg5[%c3, %c0_10] : memref<8x128xf32, #tpu.memory_space<vmem>>, vector<1x128xf32>
    %38 = vector.shape_cast %37 : vector<1x128xf32> to vector<128xf32>
    %39 = vector.shape_cast %36 : vector<128xf32> to vector<1x128xf32>
    tpu.vector_store %arg5[%c3, %c0_10], %39 {strides = array<i32>} : memref<8x128xf32, #tpu.memory_space<vmem>>, vector<1x128xf32>,
    %c8_i32_11 = arith.constant 8 : i32
    %40 = arith.muli %arg0, %c8_i32_11 : i32
    %c4_i32 = arith.constant 4 : i32
    %41 = arith.addi %40, %c4_i32 : i32
    %42 = arith.index_cast %41 : i32 to index
    %43 = memref.load %arg1[%42] : memref<16xi32, #tpu.memory_space<smem>>
    %44 = arith.index_cast %43 : i32 to index
    %c0_12 = arith.constant 0 : index
    %45 = vector.load %arg3[%44, %c0_12] : memref<8x128xf32, #tpu.memory_space<vmem>>, vector<1x128xf32>
    %46 = vector.shape_cast %45 : vector<1x128xf32> to vector<128xf32>
    %c4 = arith.constant 4 : index
    %c0_13 = arith.constant 0 : index
    %47 = vector.load %arg5[%c4, %c0_13] : memref<8x128xf32, #tpu.memory_space<vmem>>, vector<1x128xf32>
    %48 = vector.shape_cast %47 : vector<1x128xf32> to vector<128xf32>
    %49 = vector.shape_cast %46 : vector<128xf32> to vector<1x128xf32>
    tpu.vector_store %arg5[%c4, %c0_13], %49 {strides = array<i32>} : memref<8x128xf32, #tpu.memory_space<vmem>>, vector<1x128xf32>,
    %c8_i32_14 = arith.constant 8 : i32
    %50 = arith.muli %arg0, %c8_i32_14 : i32
    %c5_i32 = arith.constant 5 : i32
    %51 = arith.addi %50, %c5_i32 : i32
    %52 = arith.index_cast %51 : i32 to index
    %53 = memref.load %arg1[%52] : memref<16xi32, #tpu.memory_space<smem>>
    %54 = arith.index_cast %53 : i32 to index
    %c0_15 = arith.constant 0 : index
    %55 = vector.load %arg3[%54, %c0_15] : memref<8x128xf32, #tpu.memory_space<vmem>>, vector<1x128xf32>
    %56 = vector.shape_cast %55 : vector<1x128xf32> to vector<128xf32>
    %c5 = arith.constant 5 : index
    %c0_16 = arith.constant 0 : index
    %57 = vector.load %arg5[%c5, %c0_16] : memref<8x128xf32, #tpu.memory_space<vmem>>, vector<1x128xf32>
    %58 = vector.shape_cast %57 : vector<1x128xf32> to vector<128xf32>
    %59 = vector.shape_cast %56 : vector<128xf32> to vector<1x128xf32>
    tpu.vector_store %arg5[%c5, %c0_16], %59 {strides = array<i32>} : memref<8x128xf32, #tpu.memory_space<vmem>>, vector<1x128xf32>,
    %c8_i32_17 = arith.constant 8 : i32
    %60 = arith.muli %arg0, %c8_i32_17 : i32
    %c6_i32 = arith.constant 6 : i32
    %61 = arith.addi %60, %c6_i32 : i32
    %62 = arith.index_cast %61 : i32 to index
    %63 = memref.load %arg1[%62] : memref<16xi32, #tpu.memory_space<smem>>
    %64 = arith.index_cast %63 : i32 to index
    %c0_18 = arith.constant 0 : index
    %65 = vector.load %arg3[%64, %c0_18] : memref<8x128xf32, #tpu.memory_space<vmem>>, vector<1x128xf32>
    %66 = vector.shape_cast %65 : vector<1x128xf32> to vector<128xf32>
    %c6 = arith.constant 6 : index
    %c0_19 = arith.constant 0 : index
    %67 = vector.load %arg5[%c6, %c0_19] : memref<8x128xf32, #tpu.memory_space<vmem>>, vector<1x128xf32>
    %68 = vector.shape_cast %67 : vector<1x128xf32> to vector<128xf32>
    %69 = vector.shape_cast %66 : vector<128xf32> to vector<1x128xf32>
    tpu.vector_store %arg5[%c6, %c0_19], %69 {strides = array<i32>} : memref<8x128xf32, #tpu.memory_space<vmem>>, vector<1x128xf32>,
    %c8_i32_20 = arith.constant 8 : i32
    %70 = arith.muli %arg0, %c8_i32_20 : i32
    %c7_i32 = arith.constant 7 : i32
    %71 = arith.addi %70, %c7_i32 : i32
    %72 = arith.index_cast %71 : i32 to index
    %73 = memref.load %arg1[%72] : memref<16xi32, #tpu.memory_space<smem>>
    %74 = arith.index_cast %73 : i32 to index
    %c0_21 = arith.constant 0 : index
    %75 = vector.load %arg3[%74, %c0_21] : memref<8x128xf32, #tpu.memory_space<vmem>>, vector<1x128xf32>
    %76 = vector.shape_cast %75 : vector<1x128xf32> to vector<128xf32>
    %c7 = arith.constant 7 : index
    %c0_22 = arith.constant 0 : index
    %77 = vector.load %arg5[%c7, %c0_22] : memref<8x128xf32, #tpu.memory_space<vmem>>, vector<1x128xf32>
    %78 = vector.shape_cast %77 : vector<1x128xf32> to vector<128xf32>
    %79 = vector.shape_cast %76 : vector<128xf32> to vector<1x128xf32>
    tpu.vector_store %arg5[%c7, %c0_22], %79 {strides = array<i32>} : memref<8x128xf32, #tpu.memory_space<vmem>>, vector<1x128xf32>,
    %c0_23 = arith.constant 0 : index
    %c0_24 = arith.constant 0 : index
    %80 = vector.load %arg2[%c0_23, %c0_24] : memref<8x128xf32, #tpu.memory_space<vmem>>, vector<8x128xf32>
    %c0_25 = arith.constant 0 : index
    %c0_26 = arith.constant 0 : index
    %81 = vector.load %arg5[%c0_25, %c0_26] : memref<8x128xf32, #tpu.memory_space<vmem>>, vector<8x128xf32>
    %82 = arith.subf %80, %81 : vector<8x128xf32>
    %83 = arith.mulf %82, %82 : vector<8x128xf32>
    %cst = arith.constant dense<0.000000e+00> : vector<8xf32>
    %84 = vector.multi_reduction <add>, %83, %cst [1] : vector<8x128xf32> to vector<8xf32>
    %85 = vector.shape_cast %84 : vector<8xf32> to vector<8x1xf32>
    %cst_27 = arith.constant 9.99999996E-13 : f32
    %cst_28 = arith.constant 9.99999995E+11 : f32
    %86 = vector.broadcast %cst_27 : f32 to vector<8x1xf32>
    %87 = arith.maximumf %86, %85 : vector<8x1xf32>
    %88 = vector.broadcast %cst_28 : f32 to vector<8x1xf32>
    %89 = arith.minimumf %88, %87 : vector<8x1xf32>
    %c0_29 = arith.constant 0 : index
    %c0_30 = arith.constant 0 : index
    %90 = vector.load %arg4[%c0_29, %c0_30] : memref<8x1xf32, #tpu.memory_space<vmem>>, vector<8x1xf32>
    tpu.vector_store %arg4[%c0_29, %c0_30], %89 {strides = array<i32>} : memref<8x1xf32, #tpu.memory_space<vmem>>, vector<8x1xf32>,
    return
  }
  func.func @transform_0(%arg0: i32, %arg1: memref<16xi32, #tpu.memory_space<smem>>) -> (i32, i32) {
    %c0_i32 = arith.constant 0 : i32
    %c0_i32_0 = arith.constant 0 : i32
    return %arg0, %c0_i32 : i32, i32
  }
  func.func @transform_1(%arg0: i32, %arg1: memref<16xi32, #tpu.memory_space<smem>>) -> (i32, i32) {
    %c0_i32 = arith.constant 0 : i32
    %c0_i32_0 = arith.constant 0 : i32
    %c0_i32_1 = arith.constant 0 : i32
    return %c0_i32, %c0_i32_0 : i32, i32
  }
  func.func @transform_2(%arg0: i32, %arg1: memref<16xi32, #tpu.memory_space<smem>>) -> (i32, i32) {
    %c0_i32 = arith.constant 0 : i32
    %c0_i32_0 = arith.constant 0 : i32
    return %arg0, %c0_i32 : i32, i32
  }
}

</mosaic_0001>

<bundles_post_ra>
// kernel: center_loss.1
= control target key start
LH: loop header
LB: loop body
LE: loop exit
PB: predicated region body
PF: predicated region fallthrough
CT: control target
= control target key end

     0   :  { %s496_s15 = smov [#allocation4]   ;;  %s630_s0 = inlined_call_operand.vmem [shape: s32[16], index: 0, kind: input, shape index: {}]   ;;  %s631_s1 = inlined_call_operand.hbm [shape: f32[16,128], index: 1, kind: input, shape index: {}]   ;;  %s632_s2 = inlined_call_operand.hbm [shape: f32[8,128], index: 2, kind: input, shape index: {}]   ;;  %s633_s3 = inlined_call_operand.vmem [shape: f32[16,1], index: 3, kind: output, shape index: {}]  }
   0x1   :  { %s9_s14 = sshll.u32 %s630_s0, 4  ;;  %s10_s14 = int_to_ptr.vmem [resolvable:$true] %s9_s14 }
   0x2   :  { %12 = dma.vmem_to_smem %s10_s14, 16, %s496_s15, [#allocation3] }
   0x3   :  { %470 = dma.done.wait [#allocation3], 16 }
   0x4   :  { %471 = vsyncadd [#allocation3], 4294967280 }
   0x5   :  { %15 = sfence }
   0x6   :  { %16 = vsyncpa [#allocation6], 0 }
   0x7   :  { %18 = vsyncpa [#allocation6 + $0x1], 0 }
   0x8   :  { %19 = vsyncpa [#allocation8], 0  ;;  %s521_s16 = smov 0   ;;  %s523_s17 = smov 0  }
   0x9   :  { %s525_s18 = smov 0   ;;  %s527_s19 = smov 0  }
   0xa LB: > { %s540_s0 = sadd.s32 4294967295, %s494_s19   ;;  %p45_p0 = scmp.ne.s32.totalorder %s486_s17, %s482_s16  ;;  %s494_s19 = sphi %s527_s19, %s640_s19   ;;  %s490_s18 = sphi %s525_s18, %s639_s18   ;;  %s486_s17 = sphi %s523_s17, %s638_s17   ;;  %s482_s16 = sphi %s521_s16, %s637_s16  }
   0xb   : > { %p46_p1 = scmp.eq.s32.totalorder %s540_s0, 0  ;;  %p319_p2 = scmp.ge.s32.totalorder %s494_s19, 1 }
   0xc   : > { %p103_p3 = scmp.lt.s32.totalorder %s494_s19, 3  ;;  %s115_s23 = sshll.u32 %s632_s2, 4  ;;  %s116_s23 = int_to_ptr.hbm [resolvable:$true] %s115_s23 }
   0xd   : > { %p548_p4 = por %p46_p1, %p45_p0  ;;  %s497_s25 = smov [#allocation7]  }
   0xe   : > { %p555_p5 = pnand %p319_p2, %p103_p3  ;;  %s117_s26 = sshll.u32 %s497_s25, 4  ;;  %s118_s26 = int_to_ptr.vmem [resolvable:$true] %s117_s26 }
   0xf   : > { %s564_s27 = sadd.s32 1, %s494_s19   ;;  %s32_s28 = sadd.s32 1, %s490_s18 }
  0x10   : > { %p337_p6 = pneg %p555_p5  ;;  %s29_s29 = ssub.s32 %s494_s19, %s564_s27 }
  0x11   : > { %p30_p8 = scmp.eq.s32.totalorder %s29_s29, 0  ;;  %p39_p9 = scmp.ne.s32.totalorder %s490_s18, %s486_s17 }
  0x12   : > { %p338_p7 = pnand %p337_p6, %p46_p1  ;;  %p40_p10 = scmp.eq.s32.totalorder %s494_s19, 0 }
  0x13   : > { %p346_p11 = scmp.lt.s32.totalorder %s494_s19, 2  ;;  %s128_s4 = sand.u32 1, %s490_s18  }
  0x14   : > { %340 = dma.hbm_to_vmem [thread:$0]  (!%p338_p7), %s116_s23, 128, %s118_s26, [#allocation8]  }
  0x15   : > { %s574_s30 = scalar_select %p30_p8, %s490_s18, %s32_s28  }
  0x16   : > { %p41_p12 = por %p40_p10, %p39_p9  ;;  %s322_s5 = sshll.u32 %s128_s4, 3 }
  0x17   : > { %s323_s6 = sshll.u32 %s494_s19, 3  ;;  %s132_s10 = scalar_lea.vmem [#allocation5], %s322_s5 }
  0x18   : > { %s136_s9 = scalar_lea.hbm %s631_s1, %s323_s6  ;;  %s140_s11 = sshll.u32 %s132_s10, 4  ;;  %s141_s11 = int_to_ptr.vmem [resolvable:$true] %s140_s11 }
  0x19   : > { %s138_s12 = sshll.u32 %s136_s9, 4  ;;  %p581_p13 = pnand %p346_p11, %p41_p12  ;;  %s139_s12 = int_to_ptr.hbm [resolvable:$true] %s138_s12 }
  0x1a   : > { %s129_s14 = scalar_lea.sflag [#allocation6], %s128_s4  ;;  %s424_s15 = sshra.s32 %s139_s12, 4  ;;  %s425_s15 = int_to_ptr.hbm [resolvable:$true] %s424_s15 }
  0x1b   : > { %s426_s16 = scalar_lea.hbm %s425_s15, 8  ;;  %p428_p2 = pneg %p581_p13 }
  0x1c   : > { %p427_p0 = scmp.ne.s32.totalorder %s425_s15, %s426_s16  ;;  %s431_s22 = scalar_lea.hbm %s631_s1, 16 }
  0x1d   : > { %p432_p7 = scmp.lt.s32.totalorder %s425_s15, %s631_s1  ;;  %p433_p8 = scmp.lt.s32.totalorder %s431_s22, %s426_s16 }
  0x1e   : > { %p429_p3 = pnand %p428_p2, %p427_p0 }
  0x1f   : > { %p434_p9 = por %p433_p8, %p432_p7 }
  0x20   : > { %p430_p6 = pneg %p429_p3 }
  0x22   : > { %p435_p10 = pnand %p434_p9, %p430_p6 }
  0x24   : > { %438 = shalt.err (!%p435_p10)
}
  0x25   : > { %344 = dma.hbm_to_vmem [thread:$0]  (!%p581_p13), %s139_s12, 128, %s141_s11, %s129_s14  }
  0x26   : > { %149 = sbr.rel (%p555_p5) target bundleno = 196 (0xc4), region = 28  ;;  %s151_s26 = sand.u32 (!%p555_p5), 1, %s486_s17  }
  0x27   : > { %s598_s28 = sshll.u32 (!%p555_p5), %s151_s26, 3  ;;  %s152_s29 = scalar_lea.sflag (!%p555_p5), [#allocation6], %s151_s26 }
  0x28   : > { %s155_s4 = scalar_lea.vmem (!%p555_p5), [#allocation5], %s598_s28 }
  0x2b   : > { %473 = dma.done.wait (%p548_p4), %s152_s29, 128  }
  0x2c   : > { %475 = vsyncadd (%p548_p4), %s152_s29, 4294967168 }
  0x2d   : > { %477 = dma.done.wait (%p46_p1), [#allocation8], 128  }
  0x2e   : > { %479 = vsyncadd (%p46_p1), [#allocation8], 4294967168  ;;  %s328_s24 = sshll.u32 %s540_s0, 3  ;;  %v225_v8 = vld [vmem:[%s155_s4] sm:$0xff]  ;;  %p181_p1 = scmp.lt.s32.totalorder %s540_s0, 1  ;;  %vm233_vm0 = vcmask 7168  }
  0x2f   : > { %s186_s5 = sld [smem:[#allocation4 + %s328_s24]]  ;;  %s190_s6 = sadd.s32 1, %s328_s24 }
  0x30   : > { %s191_s7 = sld [smem:[#allocation4 + %s190_s6]]  ;;  %s195_s8 = sadd.s32 2, %s328_s24 }
  0x31   : > { %s196_s9 = sld [smem:[#allocation4 + %s195_s8]]  ;;  %s200_s10 = sadd.s32 3, %s328_s24 }
  0x32   : > { %s201_s11 = sld [smem:[#allocation4 + %s200_s10]]  ;;  %s205_s12 = sadd.s32 4, %s328_s24 }
  0x33   : > { %s206_s13 = sld [smem:[#allocation4 + %s205_s12]]  ;;  %s210_s14 = sadd.s32 5, %s328_s24 }
  0x34   : > { %s211_s20 = sld [smem:[#allocation4 + %s210_s14]]  ;;  %s215_s15 = sadd.s32 6, %s328_s24 }
  0x35   : > { %s216_s16 = sld [smem:[#allocation4 + %s215_s15]]  ;;  %s187_s19 = scalar_lea.vmem [#allocation7], %s186_s5 }
  0x36   : > { %v188_v0 = vld [vmem:[%s187_s19] sm:$0x1]  ;;  %s220_s21 = sadd.s32 7, %s328_s24  ;;  %s192_s22 = scalar_lea.vmem [#allocation7], %s191_s7 }
  0x37   : > { %189 = vst [vmem:[#allocation2] sm:$0x1] %v188_v0  ;;  %v193_v1 = vld [vmem:[%s192_s22] sm:$0x1]  ;;  %s221_s23 = sld [smem:[#allocation4 + %s220_s21]]  ;;  %s197_s25 = scalar_lea.vmem [#allocation7], %s196_s9 }
  0x38   : > { %194 = vst [vmem:[#allocation2 + $0x1] sm:$0x1] %v193_v1  ;;  %v198_v2 = vld [vmem:[%s197_s25] sm:$0x1]  ;;  %s202_s26 = scalar_lea.vmem [#allocation7], %s201_s11  ;;  %s642_s0 = smov (!%p181_p1, %s540_s0), 1 }
  0x39   : > { %199 = vst [vmem:[#allocation2 + $0x2] sm:$0x1] %v198_v2  ;;  %v203_v3 = vld [vmem:[%s202_s26] sm:$0x1]  ;;  %s207_s29 = scalar_lea.vmem [#allocation7], %s206_s13  ;;  %s327_s7 = sshll.u32 %s642_s0, 3 }
  0x3a   : > { %204 = vst [vmem:[#allocation2 + $0x3] sm:$0x1] %v203_v3  ;;  %v208_v4 = vld [vmem:[%s207_s29] sm:$0x1]  ;;  %s212_s5 = scalar_lea.vmem [#allocation7], %s211_s20  ;;  %s184_s10 = scalar_lea.vmem %s633_s3, %s327_s7 }
  0x3b   : > { %209 = vst [vmem:[#allocation2 + $0x4] sm:$0x1] %v208_v4  ;;  %v213_v5 = vld [vmem:[%s212_s5] sm:$0x1]  ;;  %s217_s24 = scalar_lea.vmem [#allocation7], %s216_s16 }
  0x3c   : > { %214 = vst [vmem:[#allocation2 + $0x5] sm:$0x1] %v213_v5  ;;  %v218_v6 = vld [vmem:[%s217_s24] sm:$0x1] }
  0x3d   : > { %219 = vst [vmem:[#allocation2 + $0x6] sm:$0x1] %v218_v6  ;;  %s222_s6 = scalar_lea.vmem [#allocation7], %s221_s23 }
  0x3e   : > { %v223_v7 = vld [vmem:[%s222_s6] sm:$0x1] }
  0x3f   : > { %224 = vst [vmem:[#allocation2 + $0x7] sm:$0x1] %v223_v7 }
  0x46   : > { %v226_v9 = vld [vmem:[#allocation2] sm:$0xff] }
  0x47   : > { %v227_v10 = vsub.f32 %v225_v8, %v226_v9 }
  0x49   : > { %v228_v11 = vmul.f32 %v227_v10, %v227_v10 }
  0x4b   : > { %229 = vadd.xlane.f32.xlu0 %v228_v11 }
  0xbe   : > { %v230_v12 = vpop.xlane.xlu0 %229 }
  0xbf   : > { %v231_v13 = vmax.f32 %v230_v12, 1e-12 }
  0xc1   : > { %v232_v14 = vmin.f32 %v231_v13, 1e+12 }
  0xc3   : > { %234 = vst.msk [vmem:[%s184_s10] sm:$0xff] %vm233_vm0, %v232_v14 }
  0xc4 PF: > { %p22_p4 = scmp.ge.s32.totalorder %s564_s27, 4   ;;  %s637_s16 = smov %s486_s17 }
  0xc5   : > { %s638_s17 = smov %s490_s18  ;;  %s639_s18 = smov %s574_s30 }
  0xc6   : > { %s640_s19 = smov %s564_s27  ;;  %24 = sbr.rel (!%p22_p4) target bundleno = 10 (0xa), region = 80 }
  0xcb   :  { %254 = vsyncpa [#allocation6], 1 }
  0xcc   :  { %256 = vsyncpa [#allocation6 + $0x1], 1 }
  0xcd   :  { %257 = vsyncpa [#allocation8], 1 }

</bundles_post_ra>
